<compile_context>
chip_gen: v7x
topology: tpu7x:2x2x1
jax: 0.10.0
libtpu: 0.0.40
codegen_flags: <defaults>
</compile_context>

<pallas_src>
import functools

import jax
import jax.numpy as jnp
from jax import lax
from jax.experimental import pallas as pl
from jax.experimental.pallas import tpu as pltpu

LN_EPS = 1e-5  # PyTorch nn.LayerNorm default


def _round_up(x, m):
    return ((x + m - 1) // m) * m


def _pick_batch_tile(batch):
    """Batch tile: 8-sublane aligned.  For batches > 256, keep >=2 grid steps
    (so v7x's two TensorCores both get work under "parallel" semantics) and
    prefer multiples of 256 to fill the 2x256^2 MXU M dimension (v6e/v7x)."""
    if batch <= 256:
        return _round_up(max(batch, 1), 8)
    return min(512, _round_up(pl.cdiv(batch, 2), 256))


def _layernorm_fused(h, gamma, beta, true_n):
    """Fused-statistics LayerNorm over the last axis.

    `h` has zero-valued padding lanes beyond `true_n`, so summing over the full
    (padded) width equals summing over the true lanes; divide by true_n.
    gamma/beta are zero on padded lanes, which re-zeroes them after scaling.
    """
    inv_n = 1.0 / float(true_n)
    s1 = jnp.sum(h, axis=-1, keepdims=True)
    s2 = jnp.sum(h * h, axis=-1, keepdims=True)
    mu = s1 * inv_n
    var = s2 * inv_n - mu * mu
    return (h - mu) * lax.rsqrt(var + LN_EPS) * gamma + beta


def mlp_kernel(x_ref, w1_ref, w2_ref, w3_ref, vecs_ref, b3_ref, o_ref, *,
               hidden_dim):
    # In-kernel bf16 cast of the activation tile (no-op if x already bf16).
    x = x_ref[...].astype(jnp.bfloat16)

    # Packed resident vectors: rows 0..5 = b1, g1, be1, b2, g2, be2.
    v = vecs_ref[...]
    b1, g1, be1 = v[0:1, :], v[1:2, :], v[2:3, :]
    b2, g2, be2 = v[3:4, :], v[4:5, :], v[5:6, :]

    # fc1 -> ln1 -> relu   (bf16 operands, f32 accumulate, f32 elementwise)
    h1 = jnp.dot(x, w1_ref[...], preferred_element_type=jnp.float32) + b1
    h1 = jnp.maximum(_layernorm_fused(h1, g1, be1, hidden_dim), 0.0)

    # fc2 -> ln2 -> relu
    h2 = jnp.dot(h1.astype(jnp.bfloat16), w2_ref[...],
                 preferred_element_type=jnp.float32) + b2
    h2 = jnp.maximum(_layernorm_fused(h2, g2, be2, hidden_dim), 0.0)

    # fc3 -> tanh  (out_fn='tanh'; for out_fn='linear' drop the tanh)
    out = jnp.dot(h2.astype(jnp.bfloat16), w3_ref[...],
                  preferred_element_type=jnp.float32) + b3_ref[...]
    o_ref[...] = jnp.tanh(out).astype(o_ref.dtype)


def init_params(key, input_dim, hidden_dim, out_dim):
    """Unpadded f32 params mirroring the PyTorch module (weights stored as W.T).

    fc1/fc2: uniform(-1/sqrt(fan_in), 1/sqrt(fan_in)) like nn.Linear default.
    fc3: weight uniform(-0.003, 0.003) as done for out_fn='tanh' (bias default).
    LayerNorm: gamma=1, beta=0.
    """
    ks = jax.random.split(key, 6)

    def lin(kw, kb, fan_in, fan_out, w_bound=None):
        wb = w_bound if w_bound is not None else 1.0 / float(fan_in) ** 0.5
        bb = 1.0 / float(fan_in) ** 0.5
        w = jax.random.uniform(kw, (fan_in, fan_out), jnp.float32, -wb, wb)
        b = jax.random.uniform(kb, (fan_out,), jnp.float32, -bb, bb)
        return w, b

    w1, b1 = lin(ks[0], ks[1], input_dim, hidden_dim)
    w2, b2 = lin(ks[2], ks[3], hidden_dim, hidden_dim)
    w3, b3 = lin(ks[4], ks[5], hidden_dim, out_dim, w_bound=0.003)

    return dict(w1=w1, b1=b1, g1=jnp.ones((hidden_dim,), jnp.float32),
                be1=jnp.zeros((hidden_dim,), jnp.float32),
                w2=w2, b2=b2, g2=jnp.ones((hidden_dim,), jnp.float32),
                be2=jnp.zeros((hidden_dim,), jnp.float32),
                w3=w3, b3=b3)


def prepare_params(p, input_dim, hidden_dim, out_dim):
    """Pad feature dims to multiples of 128, cast weights to bf16, and pack
    the six hidden-width bias/LN vectors into one sublane-dense (8, hid_p)
    f32 tile (rows 0..5 = b1,g1,be1,b2,g2,be2; rows 6,7 zero padding)."""
    in_p = _round_up(input_dim, 128)
    hid_p = _round_up(hidden_dim, 128)
    out_p = _round_up(out_dim, 128)

    def pad_w(w, r, c):
        return jnp.zeros((r, c), jnp.bfloat16).at[:w.shape[0], :w.shape[1]].set(
            w.astype(jnp.bfloat16))

    def row(v, c):
        return jnp.zeros((c,), jnp.float32).at[:v.shape[-1]].set(
            v.reshape(-1).astype(jnp.float32))

    vecs = jnp.stack(
        [row(p["b1"], hid_p), row(p["g1"], hid_p), row(p["be1"], hid_p),
         row(p["b2"], hid_p), row(p["g2"], hid_p), row(p["be2"], hid_p),
         jnp.zeros((hid_p,), jnp.float32), jnp.zeros((hid_p,), jnp.float32)],
        axis=0)

    return dict(
        w1=pad_w(p["w1"], in_p, hid_p),
        w2=pad_w(p["w2"], hid_p, hid_p),
        w3=pad_w(p["w3"], hid_p, out_p),
        vecs=vecs,
        b3=row(p["b3"], out_p).reshape(1, out_p),
    )


def _build_mlp_call(*, hidden_dim, grid_n, tb, in_p, hid_p, out_p, b_p,
                    out_dtype, vmem_limit, cost, single_buffer_params):
    if single_buffer_params:
        def resident(shape):
            # Constant block index -> fetched once and kept VMEM-resident;
            # a single buffer avoids the default 2x double-buffer VMEM cost.
            return pl.BlockSpec(shape, lambda i: (0, 0),
                                pipeline_mode=pl.Buffered(1))
    else:
        def resident(shape):
            return pl.BlockSpec(shape, lambda i: (0, 0))

    in_specs = [
        pl.BlockSpec((tb, in_p), lambda i: (i, 0)),   # x tile (double-buffered)
        resident((in_p, hid_p)),                      # w1 (bf16)
        resident((hid_p, hid_p)),                     # w2 (bf16)
        resident((hid_p, out_p)),                     # w3 (bf16)
        resident((8, hid_p)),                         # packed b1,g1,be1,b2,g2,be2
        resident((1, out_p)),                         # b3
    ]
    out_specs = pl.BlockSpec((tb, out_p), lambda i: (i, 0))  # lane-dense store

    return pl.pallas_call(
        functools.partial(mlp_kernel, hidden_dim=hidden_dim),
        out_shape=jax.ShapeDtypeStruct((b_p, out_p), out_dtype),
        grid=(grid_n,),
        in_specs=in_specs,
        out_specs=out_specs,
        compiler_params=pltpu.CompilerParams(
            dimension_semantics=("parallel",),
            vmem_limit_bytes=vmem_limit),
        cost_estimate=cost,
    )


def mlp_network_forward(x, prep, input_dim, hidden_dim, out_dim,
                        out_dtype=jnp.bfloat16):
    """x: (B, input_dim) float32. prep: padded/bf16 params from prepare_params."""
    B = x.shape[0]
    in_p = prep["w1"].shape[0]
    hid_p = prep["w1"].shape[1]
    out_p = prep["w3"].shape[1]

    tb = _pick_batch_tile(B)
    grid_n = pl.cdiv(B, tb)
    b_p = grid_n * tb

    # Skip the wrapper-side pad/cast HBM pass when shapes already align; the
    # bf16 cast then happens in-kernel, hidden under the matmuls.
    if B == b_p and input_dim == in_p:
        x_in = x
    else:
        x_in = jnp.zeros((b_p, in_p), jnp.bfloat16).at[:B, :input_dim].set(
            x.astype(jnp.bfloat16))
    x_bytes = jnp.dtype(x_in.dtype).itemsize
    o_bytes = jnp.dtype(out_dtype).itemsize

    # --- VMEM budget (corrected accounting) ---------------------------------
    weight_bytes = 2 * (in_p * hid_p + hid_p * hid_p + hid_p * out_p)  # bf16, x1 buffer
    vec_bytes = 4 * (8 * hid_p + 8 * out_p)                            # f32, 8-sublane padded, x1
    act_bytes = 2 * tb * in_p * x_bytes                                # x tiles, double-buffered
    act_bytes += 2 * tb * out_p * o_bytes                              # out tiles, double-buffered
    act_bytes += 4 * tb * hid_p * 4 + tb * out_p * 4                   # f32 in-kernel intermediates
    budget = weight_bytes + vec_bytes + act_bytes + (4 << 20)          # compiler scratch margin

    # Per-generation cap: ~0.8 x physical VMEM (v5e/v6e: 128 MiB, v7x: 64 MiB).
    try:
        vmem_cap = int(0.8 * pltpu.get_tpu_info().vmem_capacity_bytes)
    except Exception:
        vmem_cap = 56 << 20   # conservative fallback; leaves headroom on v7x
    vmem_limit = int(min(max(budget, 16 << 20), max(vmem_cap, 16 << 20)))

    # --- Cost estimate for XLA's scheduler ----------------------------------
    flops = 2 * b_p * (in_p * hid_p + hid_p * hid_p + hid_p * out_p)
    cost = pl.CostEstimate(
        flops=int(flops),
        transcendentals=int(b_p * (2 + out_p)),   # 2 rsqrt + out_p tanh per row
        bytes_accessed=int(b_p * (in_p * x_bytes + out_p * o_bytes)
                           + weight_bytes + vec_bytes))

    args = (x_in, prep["w1"], prep["w2"], prep["w3"], prep["vecs"], prep["b3"])
    common = dict(hidden_dim=hidden_dim, grid_n=grid_n, tb=tb, in_p=in_p,
                  hid_p=hid_p, out_p=out_p, b_p=b_p, out_dtype=out_dtype,
                  vmem_limit=vmem_limit, cost=cost)
    try:
        out_arr = _build_mlp_call(single_buffer_params=True, **common)(*args)
    except Exception:
        # Fallback for environments without pipeline_mode/Buffered support:
        # identical numerics, just ~2x VMEM held by the resident weights.
        out_arr = _build_mlp_call(single_buffer_params=False, **common)(*args)

    # NOTE: consumers that can work with the padded (b_p, out_p) slab should
    # skip this slice to avoid an extra XLA pass over the output.
    return out_arr[:B, :out_dim]


def mlp_network_ref(x, prep, input_dim, hidden_dim, out_dim):
    """Pure-JAX reference mirroring the kernel numerics (bf16 operands, f32 acc)."""
    in_p = prep["w1"].shape[0]
    B = x.shape[0]
    xp = jnp.zeros((B, in_p), jnp.float32).at[:, :input_dim].set(x).astype(jnp.bfloat16)
    v = prep["vecs"]
    b1, g1, be1 = v[0:1, :], v[1:2, :], v[2:3, :]
    b2, g2, be2 = v[3:4, :], v[4:5, :], v[5:6, :]
    h1 = jnp.dot(xp, prep["w1"], preferred_element_type=jnp.float32) + b1
    h1 = jnp.maximum(_layernorm_fused(h1, g1, be1, hidden_dim), 0.0)
    h2 = jnp.dot(h1.astype(jnp.bfloat16), prep["w2"],
                 preferred_element_type=jnp.float32) + b2
    h2 = jnp.maximum(_layernorm_fused(h2, g2, be2, hidden_dim), 0.0)
    out = jnp.tanh(jnp.dot(h2.astype(jnp.bfloat16), prep["w3"],
                           preferred_element_type=jnp.float32) + prep["b3"])
    return out[:, :out_dim]


if __name__ == "__main__":
    input_dim, hidden_dim, out_dim, batch = 16, 32, 4, 2

    key = jax.random.PRNGKey(0)
    kx, kp = jax.random.split(key)
    x = jax.random.normal(kx, (batch, input_dim), jnp.float32)

    params = init_params(kp, input_dim, hidden_dim, out_dim)
    prep = prepare_params(params, input_dim, hidden_dim, out_dim)

    out = mlp_network_forward(x, prep, input_dim, hidden_dim, out_dim)
    out = jax.block_until_ready(out)

    ref = mlp_network_ref(x, prep, input_dim, hidden_dim, out_dim)
    assert out.shape == (batch, out_dim)
    assert bool(jnp.all(jnp.isfinite(out)))
    # Kernel output is bf16 (tanh range [-1,1]); compare in f32 with a
    # tolerance covering the bf16 store rounding.
    assert jnp.allclose(out.astype(jnp.float32), ref.astype(jnp.float32),
                        atol=5e-3, rtol=5e-2)

    print("KERNEL_OK")
</pallas_src>

<mosaic_0001>
module attributes {stable_mosaic.version = 11 : i64} {
  func.func @mlp_kernel(%arg0: i32, %arg1: memref<8x128xbf16, #tpu.memory_space<vmem>>, %arg2: memref<128x128xbf16, #tpu.memory_space<vmem>>, %arg3: memref<128x128xbf16, #tpu.memory_space<vmem>>, %arg4: memref<128x128xbf16, #tpu.memory_space<vmem>>, %arg5: memref<8x128xf32, #tpu.memory_space<vmem>>, %arg6: memref<1x128xf32, #tpu.memory_space<vmem>>, %arg7: memref<8x128xbf16, #tpu.memory_space<vmem>>) attributes {dimension_semantics = [#tpu.dimension_semantics<parallel>], iteration_bounds = array<i64: 1>, scalar_prefetch = 0 : i64, scratch_operands = 0 : i64, tpu.core_type = #tpu.core_type<tc>, window_params = [{transform_indices = @transform_0, window_bounds = array<i64: 8, 128>}, {pipeline_mode = #tpu.pipeline_mode<synchronous>, transform_indices = @transform_1, window_bounds = array<i64: 128, 128>}, {pipeline_mode = #tpu.pipeline_mode<synchronous>, transform_indices = @transform_2, window_bounds = array<i64: 128, 128>}, {pipeline_mode = #tpu.pipeline_mode<synchronous>, transform_indices = @transform_3, window_bounds = array<i64: 128, 128>}, {pipeline_mode = #tpu.pipeline_mode<synchronous>, transform_indices = @transform_4, window_bounds = array<i64: 8, 128>}, {pipeline_mode = #tpu.pipeline_mode<synchronous>, transform_indices = @transform_5, window_bounds = array<i64: 1, 128>}, {transform_indices = @transform_6, window_bounds = array<i64: 8, 128>}]} {
    %c0 = arith.constant 0 : index
    %c0_0 = arith.constant 0 : index
    %0 = vector.load %arg1[%c0, %c0_0] : memref<8x128xbf16, #tpu.memory_space<vmem>>, vector<8x128xbf16>
    %c0_1 = arith.constant 0 : index
    %c0_2 = arith.constant 0 : index
    %1 = vector.load %arg5[%c0_1, %c0_2] : memref<8x128xf32, #tpu.memory_space<vmem>>, vector<8x128xf32>
    %2 = vector.extract_strided_slice %1 {offsets = [0, 0], sizes = [1, 128], strides = [1, 1]} : vector<8x128xf32> to vector<1x128xf32>
    %3 = vector.extract_strided_slice %1 {offsets = [1, 0], sizes = [1, 128], strides = [1, 1]} : vector<8x128xf32> to vector<1x128xf32>
    %4 = vector.extract_strided_slice %1 {offsets = [2, 0], sizes = [1, 128], strides = [1, 1]} : vector<8x128xf32> to vector<1x128xf32>
    %5 = vector.extract_strided_slice %1 {offsets = [3, 0], sizes = [1, 128], strides = [1, 1]} : vector<8x128xf32> to vector<1x128xf32>
    %6 = vector.extract_strided_slice %1 {offsets = [4, 0], sizes = [1, 128], strides = [1, 1]} : vector<8x128xf32> to vector<1x128xf32>
    %7 = vector.extract_strided_slice %1 {offsets = [5, 0], sizes = [1, 128], strides = [1, 1]} : vector<8x128xf32> to vector<1x128xf32>
    %c0_3 = arith.constant 0 : index
    %c0_4 = arith.constant 0 : index
    %8 = vector.load %arg2[%c0_3, %c0_4] : memref<128x128xbf16, #tpu.memory_space<vmem>>, vector<128x128xbf16>
    %cst = arith.constant dense<0.000000e+00> : vector<8x128xf32>
    %9 = tpu.matmul %0, %8, %cst {dimension_numbers = #tpu.dot_dimension_numbers<[1], [0], [0], [1], [0, 0, 1, 1], [], []>} : vector<8x128xbf16>, vector<128x128xbf16>, vector<8x128xf32> -> vector<8x128xf32>
    %10 = vector.broadcast %2 : vector<1x128xf32> to vector<8x128xf32>
    %11 = arith.addf %9, %10 : vector<8x128xf32>
    %cst_5 = arith.constant dense<0.000000e+00> : vector<8xf32>
    %12 = vector.multi_reduction <add>, %11, %cst_5 [1] : vector<8x128xf32> to vector<8xf32>
    %13 = vector.shape_cast %12 : vector<8xf32> to vector<8x1xf32>
    %14 = arith.mulf %11, %11 : vector<8x128xf32>
    %cst_6 = arith.constant dense<0.000000e+00> : vector<8xf32>
    %15 = vector.multi_reduction <add>, %14, %cst_6 [1] : vector<8x128xf32> to vector<8xf32>
    %16 = vector.shape_cast %15 : vector<8xf32> to vector<8x1xf32>
    %cst_7 = arith.constant 3.125000e-02 : f32
    %17 = vector.broadcast %cst_7 : f32 to vector<8x1xf32>
    %18 = arith.mulf %13, %17 : vector<8x1xf32>
    %cst_8 = arith.constant 3.125000e-02 : f32
    %19 = vector.broadcast %cst_8 : f32 to vector<8x1xf32>
    %20 = arith.mulf %16, %19 : vector<8x1xf32>
    %21 = arith.mulf %18, %18 : vector<8x1xf32>
    %22 = arith.subf %20, %21 : vector<8x1xf32>
    %23 = vector.broadcast %18 : vector<8x1xf32> to vector<8x128xf32>
    %24 = arith.subf %11, %23 : vector<8x128xf32>
    %cst_9 = arith.constant 9.99999974E-6 : f32
    %25 = vector.broadcast %cst_9 : f32 to vector<8x1xf32>
    %26 = arith.addf %22, %25 : vector<8x1xf32>
    %27 = math.rsqrt %26 : vector<8x1xf32>
    %28 = vector.broadcast %27 : vector<8x1xf32> to vector<8x128xf32>
    %29 = arith.mulf %24, %28 : vector<8x128xf32>
    %30 = vector.broadcast %3 : vector<1x128xf32> to vector<8x128xf32>
    %31 = arith.mulf %29, %30 : vector<8x128xf32>
    %32 = vector.broadcast %4 : vector<1x128xf32> to vector<8x128xf32>
    %33 = arith.addf %31, %32 : vector<8x128xf32>
    %cst_10 = arith.constant 0.000000e+00 : f32
    %34 = vector.broadcast %cst_10 : f32 to vector<8x128xf32>
    %35 = arith.maximumf %33, %34 : vector<8x128xf32>
    %36 = arith.truncf %35 : vector<8x128xf32> to vector<8x128xbf16>
    %c0_11 = arith.constant 0 : index
    %c0_12 = arith.constant 0 : index
    %37 = vector.load %arg3[%c0_11, %c0_12] : memref<128x128xbf16, #tpu.memory_space<vmem>>, vector<128x128xbf16>
    %cst_13 = arith.constant dense<0.000000e+00> : vector<8x128xf32>
    %38 = tpu.matmul %36, %37, %cst_13 {dimension_numbers = #tpu.dot_dimension_numbers<[1], [0], [0], [1], [0, 0, 1, 1], [], []>} : vector<8x128xbf16>, vector<128x128xbf16>, vector<8x128xf32> -> vector<8x128xf32>
    %39 = vector.broadcast %5 : vector<1x128xf32> to vector<8x128xf32>
    %40 = arith.addf %38, %39 : vector<8x128xf32>
    %cst_14 = arith.constant dense<0.000000e+00> : vector<8xf32>
    %41 = vector.multi_reduction <add>, %40, %cst_14 [1] : vector<8x128xf32> to vector<8xf32>
    %42 = vector.shape_cast %41 : vector<8xf32> to vector<8x1xf32>
    %43 = arith.mulf %40, %40 : vector<8x128xf32>
    %cst_15 = arith.constant dense<0.000000e+00> : vector<8xf32>
    %44 = vector.multi_reduction <add>, %43, %cst_15 [1] : vector<8x128xf32> to vector<8xf32>
    %45 = vector.shape_cast %44 : vector<8xf32> to vector<8x1xf32>
    %cst_16 = arith.constant 3.125000e-02 : f32
    %46 = vector.broadcast %cst_16 : f32 to vector<8x1xf32>
    %47 = arith.mulf %42, %46 : vector<8x1xf32>
    %cst_17 = arith.constant 3.125000e-02 : f32
    %48 = vector.broadcast %cst_17 : f32 to vector<8x1xf32>
    %49 = arith.mulf %45, %48 : vector<8x1xf32>
    %50 = arith.mulf %47, %47 : vector<8x1xf32>
    %51 = arith.subf %49, %50 : vector<8x1xf32>
    %52 = vector.broadcast %47 : vector<8x1xf32> to vector<8x128xf32>
    %53 = arith.subf %40, %52 : vector<8x128xf32>
    %cst_18 = arith.constant 9.99999974E-6 : f32
    %54 = vector.broadcast %cst_18 : f32 to vector<8x1xf32>
    %55 = arith.addf %51, %54 : vector<8x1xf32>
    %56 = math.rsqrt %55 : vector<8x1xf32>
    %57 = vector.broadcast %56 : vector<8x1xf32> to vector<8x128xf32>
    %58 = arith.mulf %53, %57 : vector<8x128xf32>
    %59 = vector.broadcast %6 : vector<1x128xf32> to vector<8x128xf32>
    %60 = arith.mulf %58, %59 : vector<8x128xf32>
    %61 = vector.broadcast %7 : vector<1x128xf32> to vector<8x128xf32>
    %62 = arith.addf %60, %61 : vector<8x128xf32>
    %cst_19 = arith.constant 0.000000e+00 : f32
    %63 = vector.broadcast %cst_19 : f32 to vector<8x128xf32>
    %64 = arith.maximumf %62, %63 : vector<8x128xf32>
    %65 = arith.truncf %64 : vector<8x128xf32> to vector<8x128xbf16>
    %c0_20 = arith.constant 0 : index
    %c0_21 = arith.constant 0 : index
    %66 = vector.load %arg4[%c0_20, %c0_21] : memref<128x128xbf16, #tpu.memory_space<vmem>>, vector<128x128xbf16>
    %cst_22 = arith.constant dense<0.000000e+00> : vector<8x128xf32>
    %67 = tpu.matmul %65, %66, %cst_22 {dimension_numbers = #tpu.dot_dimension_numbers<[1], [0], [0], [1], [0, 0, 1, 1], [], []>} : vector<8x128xbf16>, vector<128x128xbf16>, vector<8x128xf32> -> vector<8x128xf32>
    %c0_23 = arith.constant 0 : index
    %c0_24 = arith.constant 0 : index
    %68 = vector.load %arg6[%c0_23, %c0_24] : memref<1x128xf32, #tpu.memory_space<vmem>>, vector<1x128xf32>
    %69 = vector.broadcast %68 : vector<1x128xf32> to vector<8x128xf32>
    %70 = arith.addf %67, %69 : vector<8x128xf32>
    %71 = math.tanh %70 : vector<8x128xf32>
    %72 = arith.truncf %71 : vector<8x128xf32> to vector<8x128xbf16>
    %c0_25 = arith.constant 0 : index
    %c0_26 = arith.constant 0 : index
    %73 = vector.load %arg7[%c0_25, %c0_26] : memref<8x128xbf16, #tpu.memory_space<vmem>>, vector<8x128xbf16>
    tpu.vector_store %arg7[%c0_25, %c0_26], %72 {strides = array<i32>} : memref<8x128xbf16, #tpu.memory_space<vmem>>, vector<8x128xbf16>,
    return
  }
  func.func @transform_0(%arg0: i32) -> (i32, i32) {
    %c0_i32 = arith.constant 0 : i32
    %c0_i32_0 = arith.constant 0 : i32
    return %arg0, %c0_i32 : i32, i32
  }
  func.func @transform_1(%arg0: i32) -> (i32, i32) {
    %c0_i32 = arith.constant 0 : i32
    %c0_i32_0 = arith.constant 0 : i32
    %c0_i32_1 = arith.constant 0 : i32
    return %c0_i32, %c0_i32_0 : i32, i32
  }
  func.func @transform_2(%arg0: i32) -> (i32, i32) {
    %c0_i32 = arith.constant 0 : i32
    %c0_i32_0 = arith.constant 0 : i32
    %c0_i32_1 = arith.constant 0 : i32
    return %c0_i32, %c0_i32_0 : i32, i32
  }
  func.func @transform_3(%arg0: i32) -> (i32, i32) {
    %c0_i32 = arith.constant 0 : i32
    %c0_i32_0 = arith.constant 0 : i32
    %c0_i32_1 = arith.constant 0 : i32
    return %c0_i32, %c0_i32_0 : i32, i32
  }
  func.func @transform_4(%arg0: i32) -> (i32, i32) {
    %c0_i32 = arith.constant 0 : i32
    %c0_i32_0 = arith.constant 0 : i32
    %c0_i32_1 = arith.constant 0 : i32
    return %c0_i32, %c0_i32_0 : i32, i32
  }
  func.func @transform_5(%arg0: i32) -> (i32, i32) {
    %c0_i32 = arith.constant 0 : i32
    %c0_i32_0 = arith.constant 0 : i32
    %c0_i32_1 = arith.constant 0 : i32
    return %c0_i32, %c0_i32_0 : i32, i32
  }
  func.func @transform_6(%arg0: i32) -> (i32, i32) {
    %c0_i32 = arith.constant 0 : i32
    %c0_i32_0 = arith.constant 0 : i32
    return %arg0, %c0_i32 : i32, i32
  }
}

module attributes {stable_mosaic.version = 11 : i64} {
  func.func @mlp_kernel(%arg0: i32, %arg1: memref<8x128xbf16, #tpu.memory_space<vmem>>, %arg2: memref<128x128xbf16, #tpu.memory_space<vmem>>, %arg3: memref<128x128xbf16, #tpu.memory_space<vmem>>, %arg4: memref<128x128xbf16, #tpu.memory_space<vmem>>, %arg5: memref<8x128xf32, #tpu.memory_space<vmem>>, %arg6: memref<1x128xf32, #tpu.memory_space<vmem>>, %arg7: memref<8x128xbf16, #tpu.memory_space<vmem>>) attributes {dimension_semantics = [#tpu.dimension_semantics<parallel>], iteration_bounds = array<i64: 1>, scalar_prefetch = 0 : i64, scratch_operands = 0 : i64, tpu.core_type = #tpu.core_type<tc>, window_params = [{transform_indices = @transform_0, window_bounds = array<i64: 8, 128>}, {pipeline_mode = #tpu.pipeline_mode<synchronous>, transform_indices = @transform_1, window_bounds = array<i64: 128, 128>}, {pipeline_mode = #tpu.pipeline_mode<synchronous>, transform_indices = @transform_2, window_bounds = array<i64: 128, 128>}, {pipeline_mode = #tpu.pipeline_mode<synchronous>, transform_indices = @transform_3, window_bounds = array<i64: 128, 128>}, {pipeline_mode = #tpu.pipeline_mode<synchronous>, transform_indices = @transform_4, window_bounds = array<i64: 8, 128>}, {pipeline_mode = #tpu.pipeline_mode<synchronous>, transform_indices = @transform_5, window_bounds = array<i64: 1, 128>}, {transform_indices = @transform_6, window_bounds = array<i64: 8, 128>}]} {
    %c0 = arith.constant 0 : index
    %c0_0 = arith.constant 0 : index
    %0 = vector.load %arg1[%c0, %c0_0] : memref<8x128xbf16, #tpu.memory_space<vmem>>, vector<8x128xbf16>
    %c0_1 = arith.constant 0 : index
    %c0_2 = arith.constant 0 : index
    %1 = vector.load %arg5[%c0_1, %c0_2] : memref<8x128xf32, #tpu.memory_space<vmem>>, vector<8x128xf32>
    %2 = vector.extract_strided_slice %1 {offsets = [0, 0], sizes = [1, 128], strides = [1, 1]} : vector<8x128xf32> to vector<1x128xf32>
    %3 = vector.extract_strided_slice %1 {offsets = [1, 0], sizes = [1, 128], strides = [1, 1]} : vector<8x128xf32> to vector<1x128xf32>
    %4 = vector.extract_strided_slice %1 {offsets = [2, 0], sizes = [1, 128], strides = [1, 1]} : vector<8x128xf32> to vector<1x128xf32>
    %5 = vector.extract_strided_slice %1 {offsets = [3, 0], sizes = [1, 128], strides = [1, 1]} : vector<8x128xf32> to vector<1x128xf32>
    %6 = vector.extract_strided_slice %1 {offsets = [4, 0], sizes = [1, 128], strides = [1, 1]} : vector<8x128xf32> to vector<1x128xf32>
    %7 = vector.extract_strided_slice %1 {offsets = [5, 0], sizes = [1, 128], strides = [1, 1]} : vector<8x128xf32> to vector<1x128xf32>
    %c0_3 = arith.constant 0 : index
    %c0_4 = arith.constant 0 : index
    %8 = vector.load %arg2[%c0_3, %c0_4] : memref<128x128xbf16, #tpu.memory_space<vmem>>, vector<128x128xbf16>
    %cst = arith.constant dense<0.000000e+00> : vector<8x128xf32>
    %9 = tpu.matmul %0, %8, %cst {dimension_numbers = #tpu.dot_dimension_numbers<[1], [0], [0], [1], [0, 0, 1, 1], [], []>} : vector<8x128xbf16>, vector<128x128xbf16>, vector<8x128xf32> -> vector<8x128xf32>
    %10 = vector.broadcast %2 : vector<1x128xf32> to vector<8x128xf32>
    %11 = arith.addf %9, %10 : vector<8x128xf32>
    %cst_5 = arith.constant dense<0.000000e+00> : vector<8xf32>
    %12 = vector.multi_reduction <add>, %11, %cst_5 [1] : vector<8x128xf32> to vector<8xf32>
    %13 = vector.shape_cast %12 : vector<8xf32> to vector<8x1xf32>
    %14 = arith.mulf %11, %11 : vector<8x128xf32>
    %cst_6 = arith.constant dense<0.000000e+00> : vector<8xf32>
    %15 = vector.multi_reduction <add>, %14, %cst_6 [1] : vector<8x128xf32> to vector<8xf32>
    %16 = vector.shape_cast %15 : vector<8xf32> to vector<8x1xf32>
    %cst_7 = arith.constant 3.125000e-02 : f32
    %17 = vector.broadcast %cst_7 : f32 to vector<8x1xf32>
    %18 = arith.mulf %13, %17 : vector<8x1xf32>
    %cst_8 = arith.constant 3.125000e-02 : f32
    %19 = vector.broadcast %cst_8 : f32 to vector<8x1xf32>
    %20 = arith.mulf %16, %19 : vector<8x1xf32>
    %21 = arith.mulf %18, %18 : vector<8x1xf32>
    %22 = arith.subf %20, %21 : vector<8x1xf32>
    %23 = vector.broadcast %18 : vector<8x1xf32> to vector<8x128xf32>
    %24 = arith.subf %11, %23 : vector<8x128xf32>
    %cst_9 = arith.constant 9.99999974E-6 : f32
    %25 = vector.broadcast %cst_9 : f32 to vector<8x1xf32>
    %26 = arith.addf %22, %25 : vector<8x1xf32>
    %27 = math.rsqrt %26 : vector<8x1xf32>
    %28 = vector.broadcast %27 : vector<8x1xf32> to vector<8x128xf32>
    %29 = arith.mulf %24, %28 : vector<8x128xf32>
    %30 = vector.broadcast %3 : vector<1x128xf32> to vector<8x128xf32>
    %31 = arith.mulf %29, %30 : vector<8x128xf32>
    %32 = vector.broadcast %4 : vector<1x128xf32> to vector<8x128xf32>
    %33 = arith.addf %31, %32 : vector<8x128xf32>
    %cst_10 = arith.constant 0.000000e+00 : f32
    %34 = vector.broadcast %cst_10 : f32 to vector<8x128xf32>
    %35 = arith.maximumf %33, %34 : vector<8x128xf32>
    %36 = arith.truncf %35 : vector<8x128xf32> to vector<8x128xbf16>
    %c0_11 = arith.constant 0 : index
    %c0_12 = arith.constant 0 : index
    %37 = vector.load %arg3[%c0_11, %c0_12] : memref<128x128xbf16, #tpu.memory_space<vmem>>, vector<128x128xbf16>
    %cst_13 = arith.constant dense<0.000000e+00> : vector<8x128xf32>
    %38 = tpu.matmul %36, %37, %cst_13 {dimension_numbers = #tpu.dot_dimension_numbers<[1], [0], [0], [1], [0, 0, 1, 1], [], []>} : vector<8x128xbf16>, vector<128x128xbf16>, vector<8x128xf32> -> vector<8x128xf32>
    %39 = vector.broadcast %5 : vector<1x128xf32> to vector<8x128xf32>
    %40 = arith.addf %38, %39 : vector<8x128xf32>
    %cst_14 = arith.constant dense<0.000000e+00> : vector<8xf32>
    %41 = vector.multi_reduction <add>, %40, %cst_14 [1] : vector<8x128xf32> to vector<8xf32>
    %42 = vector.shape_cast %41 : vector<8xf32> to vector<8x1xf32>
    %43 = arith.mulf %40, %40 : vector<8x128xf32>
    %cst_15 = arith.constant dense<0.000000e+00> : vector<8xf32>
    %44 = vector.multi_reduction <add>, %43, %cst_15 [1] : vector<8x128xf32> to vector<8xf32>
    %45 = vector.shape_cast %44 : vector<8xf32> to vector<8x1xf32>
    %cst_16 = arith.constant 3.125000e-02 : f32
    %46 = vector.broadcast %cst_16 : f32 to vector<8x1xf32>
    %47 = arith.mulf %42, %46 : vector<8x1xf32>
    %cst_17 = arith.constant 3.125000e-02 : f32
    %48 = vector.broadcast %cst_17 : f32 to vector<8x1xf32>
    %49 = arith.mulf %45, %48 : vector<8x1xf32>
    %50 = arith.mulf %47, %47 : vector<8x1xf32>
    %51 = arith.subf %49, %50 : vector<8x1xf32>
    %52 = vector.broadcast %47 : vector<8x1xf32> to vector<8x128xf32>
    %53 = arith.subf %40, %52 : vector<8x128xf32>
    %cst_18 = arith.constant 9.99999974E-6 : f32
    %54 = vector.broadcast %cst_18 : f32 to vector<8x1xf32>
    %55 = arith.addf %51, %54 : vector<8x1xf32>
    %56 = math.rsqrt %55 : vector<8x1xf32>
    %57 = vector.broadcast %56 : vector<8x1xf32> to vector<8x128xf32>
    %58 = arith.mulf %53, %57 : vector<8x128xf32>
    %59 = vector.broadcast %6 : vector<1x128xf32> to vector<8x128xf32>
    %60 = arith.mulf %58, %59 : vector<8x128xf32>
    %61 = vector.broadcast %7 : vector<1x128xf32> to vector<8x128xf32>
    %62 = arith.addf %60, %61 : vector<8x128xf32>
    %cst_19 = arith.constant 0.000000e+00 : f32
    %63 = vector.broadcast %cst_19 : f32 to vector<8x128xf32>
    %64 = arith.maximumf %62, %63 : vector<8x128xf32>
    %65 = arith.truncf %64 : vector<8x128xf32> to vector<8x128xbf16>
    %c0_20 = arith.constant 0 : index
    %c0_21 = arith.constant 0 : index
    %66 = vector.load %arg4[%c0_20, %c0_21] : memref<128x128xbf16, #tpu.memory_space<vmem>>, vector<128x128xbf16>
    %cst_22 = arith.constant dense<0.000000e+00> : vector<8x128xf32>
    %67 = tpu.matmul %65, %66, %cst_22 {dimension_numbers = #tpu.dot_dimension_numbers<[1], [0], [0], [1], [0, 0, 1, 1], [], []>} : vector<8x128xbf16>, vector<128x128xbf16>, vector<8x128xf32> -> vector<8x128xf32>
    %c0_23 = arith.constant 0 : index
    %c0_24 = arith.constant 0 : index
    %68 = vector.load %arg6[%c0_23, %c0_24] : memref<1x128xf32, #tpu.memory_space<vmem>>, vector<1x128xf32>
    %69 = vector.broadcast %68 : vector<1x128xf32> to vector<8x128xf32>
    %70 = arith.addf %67, %69 : vector<8x128xf32>
    %71 = math.tanh %70 : vector<8x128xf32>
    %72 = arith.truncf %71 : vector<8x128xf32> to vector<8x128xbf16>
    %c0_25 = arith.constant 0 : index
    %c0_26 = arith.constant 0 : index
    %73 = vector.load %arg7[%c0_25, %c0_26] : memref<8x128xbf16, #tpu.memory_space<vmem>>, vector<8x128xbf16>
    tpu.vector_store %arg7[%c0_25, %c0_26], %72 {strides = array<i32>} : memref<8x128xbf16, #tpu.memory_space<vmem>>, vector<8x128xbf16>,
    return
  }
  func.func @transform_0(%arg0: i32) -> (i32, i32) {
    %c0_i32 = arith.constant 0 : i32
    %c0_i32_0 = arith.constant 0 : i32
    return %arg0, %c0_i32 : i32, i32
  }
  func.func @transform_1(%arg0: i32) -> (i32, i32) {
    %c0_i32 = arith.constant 0 : i32
    %c0_i32_0 = arith.constant 0 : i32
    %c0_i32_1 = arith.constant 0 : i32
    return %c0_i32, %c0_i32_0 : i32, i32
  }
  func.func @transform_2(%arg0: i32) -> (i32, i32) {
    %c0_i32 = arith.constant 0 : i32
    %c0_i32_0 = arith.constant 0 : i32
    %c0_i32_1 = arith.constant 0 : i32
    return %c0_i32, %c0_i32_0 : i32, i32
  }
  func.func @transform_3(%arg0: i32) -> (i32, i32) {
    %c0_i32 = arith.constant 0 : i32
    %c0_i32_0 = arith.constant 0 : i32
    %c0_i32_1 = arith.constant 0 : i32
    return %c0_i32, %c0_i32_0 : i32, i32
  }
  func.func @transform_4(%arg0: i32) -> (i32, i32) {
    %c0_i32 = arith.constant 0 : i32
    %c0_i32_0 = arith.constant 0 : i32
    %c0_i32_1 = arith.constant 0 : i32
    return %c0_i32, %c0_i32_0 : i32, i32
  }
  func.func @transform_5(%arg0: i32) -> (i32, i32) {
    %c0_i32 = arith.constant 0 : i32
    %c0_i32_0 = arith.constant 0 : i32
    %c0_i32_1 = arith.constant 0 : i32
    return %c0_i32, %c0_i32_0 : i32, i32
  }
  func.func @transform_6(%arg0: i32) -> (i32, i32) {
    %c0_i32 = arith.constant 0 : i32
    %c0_i32_0 = arith.constant 0 : i32
    return %arg0, %c0_i32 : i32, i32
  }
}

</mosaic_0001>

<bundles_post_ra>
// kernel: tpu_custom_call.1
= control target key start
LH: loop header
LB: loop body
LE: loop exit
PB: predicated region body
PF: predicated region fallthrough
CT: control target
= control target key end

     0   :  { %11 = vsyncpa [#allocation3], 0  ;;  %s911_s0 = inlined_call_operand.hbm [shape: bf16[8,128], index: 0, kind: input, shape index: {}]   ;;  %s912_s1 = inlined_call_operand.hbm [shape: bf16[128,128], index: 1, kind: input, shape index: {}]   ;;  %s913_s2 = inlined_call_operand.hbm [shape: bf16[128,128], index: 2, kind: input, shape index: {}]   ;;  %s914_s3 = inlined_call_operand.hbm [shape: bf16[128,128], index: 3, kind: input, shape index: {}]   ;;  %s915_s4 = inlined_call_operand.vmem [shape: f32[8,128], index: 4, kind: input, shape index: {}]   ;;  %s916_s5 = inlined_call_operand.vmem [shape: f32[1,128], index: 5, kind: input, shape index: {}]   ;;  %s917_s6 = inlined_call_operand.hbm [shape: bf16[8,128], index: 6, kind: output, shape index: {}]  }
   0x1   :  { %12 = vsyncpa [#allocation6], 0 }
   0x2   :  { %13 = vsyncpa [#allocation9], 0 }
   0x3   :  { %14 = vsyncpa [#allocation4], 0  ;;  %s746_s21 = smov [#allocation5]   ;;  %s628_s25 = scalar_lea.hbm %s912_s1, 1024 }
   0x4   :  { %s30_s22 = sshll.u32 %s746_s21, 4  ;;  %p629_p0 = scmp.ne.s32.totalorder %s912_s1, %s628_s25  ;;  %s31_s22 = int_to_ptr.vmem [resolvable:$true] %s30_s22 }
   0x5   :  { %p632_p1 = scmp.lt.u32.totalorder %s628_s25, %s912_s1 }
   0x7   :  { %p634_p2 = pnand %p632_p1, %p629_p0 }
   0x9   :  { %637 = shalt.err (!%p634_p2)
}
   0xa   :  { %s638_s30 = scalar_lea.vmem %s31_s22, 1024  ;;  %p643_p4 = scmp.lt.s32.totalorder %s31_s22, %s31_s22 }
   0xb   :  { %p639_p3 = scmp.ne.s32.totalorder %s31_s22, %s638_s30  ;;  %p644_p5 = scmp.lt.s32.totalorder %s638_s30, %s638_s30 }
   0xd   :  { %p645_p6 = por %p644_p5, %p643_p4 }
   0xf   :  { %p646_p7 = pnand %p645_p6, %p639_p3 }
  0x11   :  { %649 = shalt.err (!%p646_p7)
}
  0x12   :  { %s747_s7 = smov 64   ;;  %s748_s8 = smov 4  }
  0x13   :  { %36 = dma.hbm_to_vmem [thread:$0]  %s912_s1, 1024, %s31_s22, [#allocation6], %s747_s7, %s747_s7, %s748_s8  }
  0x14   :  { %s749_s11 = smov [#allocation2]   ;;  %s750_s13 = smov [#allocation7]  }
  0x15   :  { %s21_s12 = sshll.u32 %s749_s11, 4  ;;  %s42_s14 = sshll.u32 %s750_s13, 4  ;;  %s22_s12 = int_to_ptr.vmem [resolvable:$true] %s21_s12  ;;  %s43_s14 = int_to_ptr.vmem [resolvable:$true] %s42_s14 }
  0x16   :  { %s650_s17 = scalar_lea.hbm %s911_s0, 64 }
  0x17   :  { %p651_p8 = scmp.ne.s32.totalorder %s911_s0, %s650_s17  ;;  %p654_p9 = scmp.lt.u32.totalorder %s650_s17, %s911_s0 }
  0x19   :  { %p656_p10 = pnand %p654_p9, %p651_p8 }
  0x1b   :  { %659 = shalt.err (!%p656_p10)
}
  0x1c   :  { %s660_s1 = scalar_lea.vmem %s22_s12, 64  ;;  %p665_p12 = scmp.lt.s32.totalorder %s22_s12, %s22_s12 }
  0x1d   :  { %p661_p11 = scmp.ne.s32.totalorder %s22_s12, %s660_s1  ;;  %p666_p13 = scmp.lt.s32.totalorder %s660_s1, %s660_s1 }
  0x1f   :  { %p667_p0 = por %p666_p13, %p665_p12 }
  0x21   :  { %p668_p1 = pnand %p667_p0, %p661_p11 }
  0x23   :  { %671 = shalt.err (!%p668_p1)
}
  0x24   :  { %24 = dma.hbm_to_vmem [thread:$0]  %s911_s0, 64, %s22_s12, [#allocation3]  }
  0x25   :  { %s672_s26 = scalar_lea.hbm %s913_s2, 1024 }
  0x26   :  { %p673_p2 = scmp.ne.s32.totalorder %s913_s2, %s672_s26  ;;  %p676_p3 = scmp.lt.u32.totalorder %s672_s26, %s913_s2 }
  0x28   :  { %p678_p4 = pnand %p676_p3, %p673_p2 }
  0x2a   :  { %681 = shalt.err (!%p678_p4)
}
  0x2b   :  { %s682_s9 = scalar_lea.vmem %s43_s14, 1024  ;;  %p687_p6 = scmp.lt.s32.totalorder %s43_s14, %s43_s14 }
  0x2c   :  { %p683_p5 = scmp.ne.s32.totalorder %s43_s14, %s682_s9  ;;  %p688_p7 = scmp.lt.s32.totalorder %s682_s9, %s682_s9 }
  0x2e   :  { %p689_p8 = por %p688_p7, %p687_p6 }
  0x30   :  { %p690_p9 = pnand %p689_p8, %p683_p5 }
  0x32   :  { %693 = shalt.err (!%p690_p9)
}
  0x33   :  { %48 = dma.hbm_to_vmem [thread:$0]  %s913_s2, 1024, %s43_s14, [#allocation6], %s747_s7, %s747_s7, %s748_s8  }
  0x34   :  { %s751_s11 = smov [#allocation8]   ;;  %s694_s16 = scalar_lea.hbm %s914_s3, 1024 }
  0x35   :  { %s54_s12 = sshll.u32 %s751_s11, 4  ;;  %p695_p10 = scmp.ne.s32.totalorder %s914_s3, %s694_s16  ;;  %s55_s12 = int_to_ptr.vmem [resolvable:$true] %s54_s12 }
  0x36   :  { %p698_p11 = scmp.lt.u32.totalorder %s694_s16, %s914_s3 }
  0x38   :  { %p700_p12 = pnand %p698_p11, %p695_p10 }
  0x3a   :  { %703 = shalt.err (!%p700_p12)
}
  0x3b   :  { %s704_s21 = scalar_lea.vmem %s55_s12, 1024  ;;  %p709_p0 = scmp.lt.s32.totalorder %s55_s12, %s55_s12 }
  0x3c   :  { %p705_p13 = scmp.ne.s32.totalorder %s55_s12, %s704_s21  ;;  %p710_p1 = scmp.lt.s32.totalorder %s704_s21, %s704_s21 }
  0x3e   :  { %p711_p2 = por %p710_p1, %p709_p0 }
  0x40   :  { %p712_p3 = pnand %p711_p2, %p705_p13 }
  0x42   :  { %715 = shalt.err (!%p712_p3)
}
  0x43   :  { %60 = dma.hbm_to_vmem [thread:$0]  %s914_s3, 1024, %s55_s12, [#allocation9], %s747_s7, %s747_s7, %s748_s8  }
  0x44   :  { %738 = dma.done.wait [#allocation3], 64  }
  0x45   :  { %739 = vsyncadd [#allocation3], 4294967232 }
  0x46   :  { %740 = dma.done.wait [#allocation6], 2048  }
  0x47   :  { %741 = vsyncadd [#allocation6], 4294965248 }
  0x48   :  { %742 = dma.done.wait [#allocation9], 1024  }
  0x49   :  { %743 = vsyncadd [#allocation9], 4294966272  ;;  %v752_v0 = vmov 0.0   ;;  %vm753_vm0 = vmmov 0   ;;  %v598_v1 = vld [vmem:[#allocation5] sm:$0xff]   ;;  %v599_v2 = vld [vmem:[#allocation5 + $0x8] sm:$0xff]   ;;  %v96_v10 = vlaneseq }
  0x4a   :  { %529 = vmatprep.subr.bf16.mxu0 %v752_v0  ;;  %545 = vmatprep.mubr.msk.bf16.mxu0 %vm753_vm0, %v752_v0  ;;  %v600_v3 = vld [vmem:[#allocation5 + $0x10] sm:$0xff]   ;;  %v601_v4 = vld [vmem:[#allocation5 + $0x18] sm:$0xff]   ;;  %v602_v5 = vld [vmem:[#allocation5 + $0x20] sm:$0xff]   ;;  %s754_s1 = smov [#allocation10]  }
  0x4b   :  { %549 = vmatprep.subr.bf16.mxu1 %v752_v0  ;;  %565 = vmatprep.mubr.msk.bf16.mxu1 %vm753_vm0, %v752_v0  ;;  %v603_v6 = vld [vmem:[#allocation5 + $0x28] sm:$0xff]   ;;  %v604_v7 = vld [vmem:[#allocation5 + $0x30] sm:$0xff]   ;;  %v605_v8 = vld [vmem:[#allocation5 + $0x38] sm:$0xff]   ;;  %v863_v11 = vshrl.u32 %v96_v10, 7  ;;  %s466_s22 = sshll.u32 %s754_s1, 4  ;;  %s467_s22 = int_to_ptr.vmem [resolvable:$true] %s466_s22 }
  0x4c   :  { %530 = vmatpush3.bf16.msra.mxu0 %v598_v1  ;;  %v78_v9 = vld [vmem:[#allocation2] sm:$0xf]  ;;  %v869_v13 = vld [vmem:[%s915_s4] sm:$0xff]  ;;  %v606_v21 = vld [vmem:[#allocation7] sm:$0xff]   ;;  %s716_s23 = scalar_lea.vmem %s467_s22, 64  ;;  %p721_p5 = scmp.lt.s32.totalorder %s467_s22, %s467_s22 }
  0x4d   :  { %531 = vmatprep.subr.bf16.mxu0 %v752_v0  ;;  %v98_v12 = vsub.s32 0, %v863_v11  ;;  %550 = vmatpush3.bf16.msra.mxu1 %v606_v21  ;;  %v607_v22 = vld [vmem:[#allocation7 + $0x8] sm:$0xff]   ;;  %v608_v23 = vld [vmem:[#allocation7 + $0x10] sm:$0xff]   ;;  %v609_v24 = vld [vmem:[#allocation7 + $0x18] sm:$0xff]   ;;  %v203_v36 = vsub.s32 1, %v863_v11  ;;  %v208_v37 = vsub.s32 2, %v863_v11  ;;  %p717_p4 = scmp.ne.s32.totalorder %s467_s22, %s716_s23  ;;  %p722_p6 = scmp.lt.s32.totalorder %s716_s23, %s716_s23 }
  0x4e   :  { %551 = vmatprep.subr.bf16.mxu1 %v752_v0  ;;  %v610_v25 = vld [vmem:[#allocation7 + $0x20] sm:$0xff]   ;;  %v611_v26 = vld [vmem:[#allocation7 + $0x28] sm:$0xff]   ;;  %v612_v27 = vld [vmem:[#allocation7 + $0x30] sm:$0xff]   ;;  %v231_v47 = vsub.s32 3, %v863_v11 }
  0x4f   :  { %v99_v14 = vrot.slane %v869_v13, %v98_v12  ;;  %v613_v28 = vld [vmem:[#allocation7 + $0x38] sm:$0xff]   ;;  %v204_v39 = vrot.slane %v869_v13, %v203_v36  ;;  %v209_v42 = vrot.slane %v869_v13, %v208_v37  ;;  %v614_v55 = vld [vmem:[#allocation8] sm:$0xff]   ;;  %v615_v56 = vld [vmem:[#allocation8 + $0x8] sm:$0xff]   ;;  %p723_p7 = por %p722_p6, %p721_p5 }
  0x50   :  { %532 = vmatpush3.bf16.msra.mxu0 %v599_v2  ;;  %v232_v48 = vrot.slane %v869_v13, %v231_v47  ;;  %v616_v57 = vld [vmem:[#allocation8 + $0x10] sm:$0xff]   ;;  %v617_v58 = vld [vmem:[#allocation8 + $0x18] sm:$0xff]   ;;  %v618_v59 = vld [vmem:[#allocation8 + $0x20] sm:$0xff]  }
  0x51   :  { %533 = vmatprep.subr.bf16.mxu0 %v752_v0  ;;  %552 = vmatpush3.bf16.msra.mxu1 %v607_v22  ;;  %v619_v60 = vld [vmem:[#allocation8 + $0x28] sm:$0xff]   ;;  %v620_v61 = vld [vmem:[#allocation8 + $0x30] sm:$0xff]   ;;  %v621_v62 = vld [vmem:[#allocation8 + $0x38] sm:$0xff]   ;;  %p724_p8 = pnand %p723_p7, %p717_p4 }
  0x52   :  { %553 = vmatprep.subr.bf16.mxu1 %v752_v0 }
  0x54   :  { %534 = vmatpush3.bf16.msra.mxu0 %v600_v3 }
  0x55   :  { %535 = vmatprep.subr.bf16.mxu0 %v752_v0  ;;  %554 = vmatpush3.bf16.msra.mxu1 %v608_v23 }
  0x56   :  { %555 = vmatprep.subr.bf16.mxu1 %v752_v0 }
  0x58   :  { %536 = vmatpush3.bf16.msra.mxu0 %v601_v4 }
  0x59   :  { %537 = vmatprep.subr.bf16.mxu0 %v752_v0  ;;  %556 = vmatpush3.bf16.msra.mxu1 %v609_v24 }
  0x5a   :  { %557 = vmatprep.subr.bf16.mxu1 %v752_v0 }
  0x5c   :  { %538 = vmatpush3.bf16.msra.mxu0 %v602_v5 }
  0x5d   :  { %539 = vmatprep.subr.bf16.mxu0 %v752_v0  ;;  %558 = vmatpush3.bf16.msra.mxu1 %v610_v25 }
  0x5e   :  { %559 = vmatprep.subr.bf16.mxu1 %v752_v0 }
  0x60   :  { %540 = vmatpush3.bf16.msra.mxu0 %v603_v6 }
  0x61   :  { %541 = vmatprep.subr.bf16.mxu0 %v752_v0  ;;  %560 = vmatpush3.bf16.msra.mxu1 %v611_v26 }
  0x62   :  { %561 = vmatprep.subr.bf16.mxu1 %v752_v0 }
  0x64   :  { %542 = vmatpush3.bf16.msra.mxu0 %v604_v7  ;;  %v336_v7 = vsub.s32 4, %v863_v11 }
  0x65   :  { %543 = vmatprep.subr.bf16.mxu0 %v752_v0  ;;  %562 = vmatpush3.bf16.msra.mxu1 %v612_v27 }
  0x66   :  { %563 = vmatprep.subr.bf16.mxu1 %v752_v0  ;;  %v337_v10 = vrot.slane %v869_v13, %v336_v7 }
  0x68   :  { %544 = vmatpush3.bf16.msra.mxu0 %v605_v8  ;;  %v341_v8 = vsub.s32 5, %v863_v11 }
  0x69   :  { %569 = vmatprep.subr.bf16.mxu0 %v752_v0  ;;  %564 = vmatpush3.bf16.msra.mxu1 %v613_v28 }
  0x6b   :  { %546 = vmatmul.mubr.bf16.vlgmr.msra.gmra.mrb[0].mxu0 %v78_v9 }
  0x6c   :  { %585 = vmatprep.mubr.msk.bf16.mxu0 %vm753_vm0, %v752_v0  ;;  %570 = vmatpush3.bf16.msra.mxu0 %v614_v55 }
  0x6d   :  { %571 = vmatprep.subr.bf16.mxu0 %v752_v0 }
  0x70   :  { %572 = vmatpush3.bf16.msra.mxu0 %v615_v56 }
  0x71   :  { %573 = vmatprep.subr.bf16.mxu0 %v752_v0 }
  0x74   :  { %574 = vmatpush3.bf16.msra.mxu0 %v616_v57 }
  0x75   :  { %575 = vmatprep.subr.bf16.mxu0 %v752_v0 }
  0x78   :  { %576 = vmatpush3.bf16.msra.mxu0 %v617_v58 }
  0x79   :  { %577 = vmatprep.subr.bf16.mxu0 %v752_v0 }
  0x7c   :  { %578 = vmatpush3.bf16.msra.mxu0 %v618_v59 }
  0x7d   :  { %579 = vmatprep.subr.bf16.mxu0 %v752_v0 }
  0x80   :  { %580 = vmatpush3.bf16.msra.mxu0 %v619_v60 }
  0x81   :  { %581 = vmatprep.subr.bf16.mxu0 %v752_v0 }
  0x84   :  { %582 = vmatpush3.bf16.msra.mxu0 %v620_v61 }
  0x85   :  { %583 = vmatprep.subr.bf16.mxu0 %v752_v0  ;;  %v342_v0 = vrot.slane %v869_v13, %v341_v8 }
  0x88   :  { %584 = vmatpush3.bf16.msra.mxu0 %v621_v62 }
 0x13e   :  { %v182_v15 = vpop.f32.mrb[0].mxu0 }
 0x13f   :  { %v183_v16 = vadd.f32 %v182_v15, %v99_v14  ;;  %v547_v17 = vpop.f32.mrb[1].mxu0 }
 0x140   :  { %v185_v18 = vpop.f32.mrb[2].mxu0 }
 0x141   :  { %188 = vadd.xlane.f32.xlu0 %v183_v16  ;;  %v548_v19 = vpop.f32.mrb[3].mxu0  ;;  %v190_v20 = vmul.f32 %v183_v16, %v183_v16 }
 0x142   :  { %v493_v19 = vld [vmem:[%s916_s5] ss:$0 sm:$0xff] }
 0x145   :  { %191 = vadd.xlane.f32.xlu0 %v190_v20 }
 0x1ce   :  { %v189_v29 = vpop.xlane.xlu0 %188 }
 0x1cf   :  { %v193_v30 = vmul.f32 0.03125, %v189_v29 }
 0x1d1   :  { %v195_v32 = vmul.f32 %v193_v30, %v193_v30  ;;  %v197_v38 = vsub.f32 %v183_v16, %v193_v30 }
 0x1d2   :  { %v192_v31 = vpop.xlane.xlu0 %191 }
 0x1d3   :  { %v194_v33 = vmul.f32 0.03125, %v192_v31 }
 0x1d5   :  { %v196_v34 = vsub.f32 %v194_v33, %v195_v32 }
 0x1d7   :  { %v198_v35 = vadd.f32 1e-05, %v196_v34 }
 0x1d9   :  { %622 = vrsqrt.f32 %v198_v35 }
 0x1e3   :  { %v623_v40 = vpop.eup %622 }
 0x1e4   :  { %v200_v41 = vmul.f32 %v623_v40, %v197_v38 }
 0x1e6   :  { %v205_v43 = vmul.f32 %v204_v39, %v200_v41 }
 0x1e8   :  { %v210_v44 = vadd.f32 %v209_v42, %v205_v43 }
 0x1ea   :  { %v211_v45 = vmax.f32 %v210_v44, 0.0 }
 0x1ec   :  { %v212_v46 = vpack.c.bf16 %v211_v45, %v211_v45 }
 0x1ee   :  { %566 = vmatmul.mubr.bf16.vlgmr.msra.gmra.mrb[0].mxu1 %v212_v46 }
 0x2c1   :  { %v315_v49 = vpop.f32.mrb[0].mxu1 }
 0x2c2   :  { %v316_v50 = vadd.f32 %v315_v49, %v232_v48  ;;  %v567_v51 = vpop.f32.mrb[1].mxu1 }
 0x2c3   :  { %v318_v52 = vpop.f32.mrb[2].mxu1 }
 0x2c4   :  { %321 = vadd.xlane.f32.xlu1 %v316_v50  ;;  %v568_v53 = vpop.f32.mrb[3].mxu1  ;;  %v323_v54 = vmul.f32 %v316_v50, %v316_v50 }
 0x2c8   :  { %324 = vadd.xlane.f32.xlu1 %v323_v54 }
 0x351   :  { %v322_v63 = vpop.xlane.xlu1 %321 }
 0x352   :  { %v326_v1 = vmul.f32 0.03125, %v322_v63 }
 0x354   :  { %v328_v3 = vmul.f32 %v326_v1, %v326_v1  ;;  %v330_v9 = vsub.f32 %v316_v50, %v326_v1 }
 0x355   :  { %v325_v2 = vpop.xlane.xlu1 %324 }
 0x356   :  { %v327_v4 = vmul.f32 0.03125, %v325_v2 }
 0x358   :  { %v329_v5 = vsub.f32 %v327_v4, %v328_v3 }
 0x35a   :  { %v331_v6 = vadd.f32 1e-05, %v329_v5 }
 0x35c   :  { %624 = vrsqrt.f32 %v331_v6 }
 0x366   :  { %v625_v12 = vpop.eup %624 }
 0x367   :  { %v333_v14 = vmul.f32 %v625_v12, %v330_v9 }
 0x369   :  { %v338_v15 = vmul.f32 %v337_v10, %v333_v14 }
 0x36b   :  { %v343_v16 = vadd.f32 %v342_v0, %v338_v15 }
 0x36d   :  { %v344_v17 = vmax.f32 %v343_v16, 0.0 }
 0x36f   :  { %v345_v18 = vpack.c.bf16 %v344_v17, %v344_v17 }
 0x371   :  { %586 = vmatmul.mubr.bf16.vlgmr.msra.gmra.mrb[4].mxu0 %v345_v18 }
 0x444   :  { %v451_v20 = vpop.f32.mrb[4].mxu0 }
 0x445   :  { %v452_v21 = vadd.f32 %v493_v19, %v451_v20  ;;  %v587_v22 = vpop.f32.mrb[5].mxu0 }
 0x446   :  { %v454_v11 = vpop.f32.mrb[6].mxu0 }
 0x447   :  { %626 = vtanh.f32 %v452_v21  ;;  %v588_v23 = vpop.f32.mrb[7].mxu0 }
 0x451   :  { %v627_v24 = vpop.eup %626 }
 0x452   :  { %v458_v25 = vpack.c.bf16 %v627_v24, %v627_v24 }
 0x454   :  { %459 = vst [vmem:[#allocation10] sm:$0xf] %v458_v25 }
 0x455   :  { %727 = shalt.err (!%p724_p8)
}
 0x456   :  { %s728_s25 = scalar_lea.hbm %s917_s6, 64 }
 0x457   :  { %p729_p9 = scmp.ne.s32.totalorder %s917_s6, %s728_s25  ;;  %p732_p10 = scmp.lt.u32.totalorder %s728_s25, %s917_s6 }
 0x459   :  { %p734_p11 = pnand %p732_p10, %p729_p9 }
 0x45b   :  { %737 = shalt.err (!%p734_p11)
}
 0x45c   :  { %469 = dma.vmem_to_hbm [thread:$0]  %s467_s22, 64, %s917_s6, [#allocation4]  }
 0x45d   :  { %744 = dma.done.wait [#allocation4], 64  }
 0x45e   :  { %745 = vsyncadd [#allocation4], 4294967232 }
 0x45f   :  { %473 = vsyncpa [#allocation3], 1 }
 0x460   :  { %474 = vsyncpa [#allocation6], 1 }
 0x461   :  { %475 = vsyncpa [#allocation9], 1 }
 0x462   :  { %476 = vsyncpa [#allocation4], 1 }

// kernel: tpu_custom_call.1
= control target key start
LH: loop header
LB: loop body
LE: loop exit
PB: predicated region body
PF: predicated region fallthrough
CT: control target
= control target key end

     0   :  { %11 = vsyncpa [#allocation3], 0  ;;  %s911_s0 = inlined_call_operand.hbm [shape: bf16[8,128], index: 0, kind: input, shape index: {}]   ;;  %s912_s1 = inlined_call_operand.hbm [shape: bf16[128,128], index: 1, kind: input, shape index: {}]   ;;  %s913_s2 = inlined_call_operand.hbm [shape: bf16[128,128], index: 2, kind: input, shape index: {}]   ;;  %s914_s3 = inlined_call_operand.hbm [shape: bf16[128,128], index: 3, kind: input, shape index: {}]   ;;  %s915_s4 = inlined_call_operand.vmem [shape: f32[8,128], index: 4, kind: input, shape index: {}]   ;;  %s916_s5 = inlined_call_operand.vmem [shape: f32[1,128], index: 5, kind: input, shape index: {}]   ;;  %s917_s6 = inlined_call_operand.hbm [shape: bf16[8,128], index: 6, kind: output, shape index: {}]  }
   0x1   :  { %12 = vsyncpa [#allocation6], 0 }
   0x2   :  { %13 = vsyncpa [#allocation9], 0 }
   0x3   :  { %14 = vsyncpa [#allocation4], 0  ;;  %s746_s21 = smov [#allocation5]   ;;  %s628_s25 = scalar_lea.hbm %s912_s1, 1024 }
   0x4   :  { %s30_s22 = sshll.u32 %s746_s21, 4  ;;  %p629_p0 = scmp.ne.s32.totalorder %s912_s1, %s628_s25  ;;  %s31_s22 = int_to_ptr.vmem [resolvable:$true] %s30_s22 }
   0x5   :  { %p632_p1 = scmp.lt.u32.totalorder %s628_s25, %s912_s1 }
   0x7   :  { %p634_p2 = pnand %p632_p1, %p629_p0 }
   0x9   :  { %637 = shalt.err (!%p634_p2)
}
   0xa   :  { %s638_s30 = scalar_lea.vmem %s31_s22, 1024  ;;  %p643_p4 = scmp.lt.s32.totalorder %s31_s22, %s31_s22 }
   0xb   :  { %p639_p3 = scmp.ne.s32.totalorder %s31_s22, %s638_s30  ;;  %p644_p5 = scmp.lt.s32.totalorder %s638_s30, %s638_s30 }
   0xd   :  { %p645_p6 = por %p644_p5, %p643_p4 }
   0xf   :  { %p646_p7 = pnand %p645_p6, %p639_p3 }
  0x11   :  { %649 = shalt.err (!%p646_p7)
}
  0x12   :  { %s747_s7 = smov 64   ;;  %s748_s8 = smov 4  }
  0x13   :  { %36 = dma.hbm_to_vmem [thread:$0]  %s912_s1, 1024, %s31_s22, [#allocation6], %s747_s7, %s747_s7, %s748_s8  }
  0x14   :  { %s749_s11 = smov [#allocation2]   ;;  %s750_s13 = smov [#allocation7]  }
  0x15   :  { %s21_s12 = sshll.u32 %s749_s11, 4  ;;  %s42_s14 = sshll.u32 %s750_s13, 4  ;;  %s22_s12 = int_to_ptr.vmem [resolvable:$true] %s21_s12  ;;  %s43_s14 = int_to_ptr.vmem [resolvable:$true] %s42_s14 }
  0x16   :  { %s650_s17 = scalar_lea.hbm %s911_s0, 64 }
  0x17   :  { %p651_p8 = scmp.ne.s32.totalorder %s911_s0, %s650_s17  ;;  %p654_p9 = scmp.lt.u32.totalorder %s650_s17, %s911_s0 }
  0x19   :  { %p656_p10 = pnand %p654_p9, %p651_p8 }
  0x1b   :  { %659 = shalt.err (!%p656_p10)
}
  0x1c   :  { %s660_s1 = scalar_lea.vmem %s22_s12, 64  ;;  %p665_p12 = scmp.lt.s32.totalorder %s22_s12, %s22_s12 }
  0x1d   :  { %p661_p11 = scmp.ne.s32.totalorder %s22_s12, %s660_s1  ;;  %p666_p13 = scmp.lt.s32.totalorder %s660_s1, %s660_s1 }
  0x1f   :  { %p667_p0 = por %p666_p13, %p665_p12 }
  0x21   :  { %p668_p1 = pnand %p667_p0, %p661_p11 }
  0x23   :  { %671 = shalt.err (!%p668_p1)
}
  0x24   :  { %24 = dma.hbm_to_vmem [thread:$0]  %s911_s0, 64, %s22_s12, [#allocation3]  }
  0x25   :  { %s672_s26 = scalar_lea.hbm %s913_s2, 1024 }
  0x26   :  { %p673_p2 = scmp.ne.s32.totalorder %s913_s2, %s672_s26  ;;  %p676_p3 = scmp.lt.u32.totalorder %s672_s26, %s913_s2 }
  0x28   :  { %p678_p4 = pnand %p676_p3, %p673_p2 }
  0x2a   :  { %681 = shalt.err (!%p678_p4)
}
  0x2b   :  { %s682_s9 = scalar_lea.vmem %s43_s14, 1024  ;;  %p687_p6 = scmp.lt.s32.totalorder %s43_s14, %s43_s14 }
  0x2c   :  { %p683_p5 = scmp.ne.s32.totalorder %s43_s14, %s682_s9  ;;  %p688_p7 = scmp.lt.s32.totalorder %s682_s9, %s682_s9 }
  0x2e   :  { %p689_p8 = por %p688_p7, %p687_p6 }
  0x30   :  { %p690_p9 = pnand %p689_p8, %p683_p5 }
  0x32   :  { %693 = shalt.err (!%p690_p9)
}
  0x33   :  { %48 = dma.hbm_to_vmem [thread:$0]  %s913_s2, 1024, %s43_s14, [#allocation6], %s747_s7, %s747_s7, %s748_s8  }
  0x34   :  { %s751_s11 = smov [#allocation8]   ;;  %s694_s16 = scalar_lea.hbm %s914_s3, 1024 }
  0x35   :  { %s54_s12 = sshll.u32 %s751_s11, 4  ;;  %p695_p10 = scmp.ne.s32.totalorder %s914_s3, %s694_s16  ;;  %s55_s12 = int_to_ptr.vmem [resolvable:$true] %s54_s12 }
  0x36   :  { %p698_p11 = scmp.lt.u32.totalorder %s694_s16, %s914_s3 }
  0x38   :  { %p700_p12 = pnand %p698_p11, %p695_p10 }
  0x3a   :  { %703 = shalt.err (!%p700_p12)
}
  0x3b   :  { %s704_s21 = scalar_lea.vmem %s55_s12, 1024  ;;  %p709_p0 = scmp.lt.s32.totalorder %s55_s12, %s55_s12 }
  0x3c   :  { %p705_p13 = scmp.ne.s32.totalorder %s55_s12, %s704_s21  ;;  %p710_p1 = scmp.lt.s32.totalorder %s704_s21, %s704_s21 }
  0x3e   :  { %p711_p2 = por %p710_p1, %p709_p0 }
  0x40   :  { %p712_p3 = pnand %p711_p2, %p705_p13 }
  0x42   :  { %715 = shalt.err (!%p712_p3)
}
  0x43   :  { %60 = dma.hbm_to_vmem [thread:$0]  %s914_s3, 1024, %s55_s12, [#allocation9], %s747_s7, %s747_s7, %s748_s8  }
  0x44   :  { %738 = dma.done.wait [#allocation3], 64  }
  0x45   :  { %739 = vsyncadd [#allocation3], 4294967232 }
  0x46   :  { %740 = dma.done.wait [#allocation6], 2048  }
  0x47   :  { %741 = vsyncadd [#allocation6], 4294965248 }
  0x48   :  { %742 = dma.done.wait [#allocation9], 1024  }
  0x49   :  { %743 = vsyncadd [#allocation9], 4294966272  ;;  %v752_v0 = vmov 0.0   ;;  %vm753_vm0 = vmmov 0   ;;  %v598_v1 = vld [vmem:[#allocation5] sm:$0xff]   ;;  %v599_v2 = vld [vmem:[#allocation5 + $0x8] sm:$0xff]   ;;  %v96_v10 = vlaneseq }
  0x4a   :  { %529 = vmatprep.subr.bf16.mxu0 %v752_v0  ;;  %545 = vmatprep.mubr.msk.bf16.mxu0 %vm753_vm0, %v752_v0  ;;  %v600_v3 = vld [vmem:[#allocation5 + $0x10] sm:$0xff]   ;;  %v601_v4 = vld [vmem:[#allocation5 + $0x18] sm:$0xff]   ;;  %v602_v5 = vld [vmem:[#allocation5 + $0x20] sm:$0xff]   ;;  %s754_s1 = smov [#allocation10]  }
  0x4b   :  { %549 = vmatprep.subr.bf16.mxu1 %v752_v0  ;;  %565 = vmatprep.mubr.msk.bf16.mxu1 %vm753_vm0, %v752_v0  ;;  %v603_v6 = vld [vmem:[#allocation5 + $0x28] sm:$0xff]   ;;  %v604_v7 = vld [vmem:[#allocation5 + $0x30] sm:$0xff]   ;;  %v605_v8 = vld [vmem:[#allocation5 + $0x38] sm:$0xff]   ;;  %v863_v11 = vshrl.u32 %v96_v10, 7  ;;  %s466_s22 = sshll.u32 %s754_s1, 4  ;;  %s467_s22 = int_to_ptr.vmem [resolvable:$true] %s466_s22 }
  0x4c   :  { %530 = vmatpush3.bf16.msra.mxu0 %v598_v1  ;;  %v78_v9 = vld [vmem:[#allocation2] sm:$0xf]  ;;  %v869_v13 = vld [vmem:[%s915_s4] sm:$0xff]  ;;  %v606_v21 = vld [vmem:[#allocation7] sm:$0xff]   ;;  %s716_s23 = scalar_lea.vmem %s467_s22, 64  ;;  %p721_p5 = scmp.lt.s32.totalorder %s467_s22, %s467_s22 }
  0x4d   :  { %531 = vmatprep.subr.bf16.mxu0 %v752_v0  ;;  %v98_v12 = vsub.s32 0, %v863_v11  ;;  %550 = vmatpush3.bf16.msra.mxu1 %v606_v21  ;;  %v607_v22 = vld [vmem:[#allocation7 + $0x8] sm:$0xff]   ;;  %v608_v23 = vld [vmem:[#allocation7 + $0x10] sm:$0xff]   ;;  %v609_v24 = vld [vmem:[#allocation7 + $0x18] sm:$0xff]   ;;  %v203_v36 = vsub.s32 1, %v863_v11  ;;  %v208_v37 = vsub.s32 2, %v863_v11  ;;  %p717_p4 = scmp.ne.s32.totalorder %s467_s22, %s716_s23  ;;  %p722_p6 = scmp.lt.s32.totalorder %s716_s23, %s716_s23 }
  0x4e   :  { %551 = vmatprep.subr.bf16.mxu1 %v752_v0  ;;  %v610_v25 = vld [vmem:[#allocation7 + $0x20] sm:$0xff]   ;;  %v611_v26 = vld [vmem:[#allocation7 + $0x28] sm:$0xff]   ;;  %v612_v27 = vld [vmem:[#allocation7 + $0x30] sm:$0xff]   ;;  %v231_v47 = vsub.s32 3, %v863_v11 }
  0x4f   :  { %v99_v14 = vrot.slane %v869_v13, %v98_v12  ;;  %v613_v28 = vld [vmem:[#allocation7 + $0x38] sm:$0xff]   ;;  %v204_v39 = vrot.slane %v869_v13, %v203_v36  ;;  %v209_v42 = vrot.slane %v869_v13, %v208_v37  ;;  %v614_v55 = vld [vmem:[#allocation8] sm:$0xff]   ;;  %v615_v56 = vld [vmem:[#allocation8 + $0x8] sm:$0xff]   ;;  %p723_p7 = por %p722_p6, %p721_p5 }
  0x50   :  { %532 = vmatpush3.bf16.msra.mxu0 %v599_v2  ;;  %v232_v48 = vrot.slane %v869_v13, %v231_v47  ;;  %v616_v57 = vld [vmem:[#allocation8 + $0x10] sm:$0xff]   ;;  %v617_v58 = vld [vmem:[#allocation8 + $0x18] sm:$0xff]   ;;  %v618_v59 = vld [vmem:[#allocation8 + $0x20] sm:$0xff]  }
  0x51   :  { %533 = vmatprep.subr.bf16.mxu0 %v752_v0  ;;  %552 = vmatpush3.bf16.msra.mxu1 %v607_v22  ;;  %v619_v60 = vld [vmem:[#allocation8 + $0x28] sm:$0xff]   ;;  %v620_v61 = vld [vmem:[#allocation8 + $0x30] sm:$0xff]   ;;  %v621_v62 = vld [vmem:[#allocation8 + $0x38] sm:$0xff]   ;;  %p724_p8 = pnand %p723_p7, %p717_p4 }
  0x52   :  { %553 = vmatprep.subr.bf16.mxu1 %v752_v0 }
  0x54   :  { %534 = vmatpush3.bf16.msra.mxu0 %v600_v3 }
  0x55   :  { %535 = vmatprep.subr.bf16.mxu0 %v752_v0  ;;  %554 = vmatpush3.bf16.msra.mxu1 %v608_v23 }
  0x56   :  { %555 = vmatprep.subr.bf16.mxu1 %v752_v0 }
  0x58   :  { %536 = vmatpush3.bf16.msra.mxu0 %v601_v4 }
  0x59   :  { %537 = vmatprep.subr.bf16.mxu0 %v752_v0  ;;  %556 = vmatpush3.bf16.msra.mxu1 %v609_v24 }
  0x5a   :  { %557 = vmatprep.subr.bf16.mxu1 %v752_v0 }
  0x5c   :  { %538 = vmatpush3.bf16.msra.mxu0 %v602_v5 }
  0x5d   :  { %539 = vmatprep.subr.bf16.mxu0 %v752_v0  ;;  %558 = vmatpush3.bf16.msra.mxu1 %v610_v25 }
  0x5e   :  { %559 = vmatprep.subr.bf16.mxu1 %v752_v0 }
  0x60   :  { %540 = vmatpush3.bf16.msra.mxu0 %v603_v6 }
  0x61   :  { %541 = vmatprep.subr.bf16.mxu0 %v752_v0  ;;  %560 = vmatpush3.bf16.msra.mxu1 %v611_v26 }
  0x62   :  { %561 = vmatprep.subr.bf16.mxu1 %v752_v0 }
  0x64   :  { %542 = vmatpush3.bf16.msra.mxu0 %v604_v7  ;;  %v336_v7 = vsub.s32 4, %v863_v11 }
  0x65   :  { %543 = vmatprep.subr.bf16.mxu0 %v752_v0  ;;  %562 = vmatpush3.bf16.msra.mxu1 %v612_v27 }
  0x66   :  { %563 = vmatprep.subr.bf16.mxu1 %v752_v0  ;;  %v337_v10 = vrot.slane %v869_v13, %v336_v7 }
  0x68   :  { %544 = vmatpush3.bf16.msra.mxu0 %v605_v8  ;;  %v341_v8 = vsub.s32 5, %v863_v11 }
  0x69   :  { %569 = vmatprep.subr.bf16.mxu0 %v752_v0  ;;  %564 = vmatpush3.bf16.msra.mxu1 %v613_v28 }
  0x6b   :  { %546 = vmatmul.mubr.bf16.vlgmr.msra.gmra.mrb[0].mxu0 %v78_v9 }
  0x6c   :  { %585 = vmatprep.mubr.msk.bf16.mxu0 %vm753_vm0, %v752_v0  ;;  %570 = vmatpush3.bf16.msra.mxu0 %v614_v55 }
  0x6d   :  { %571 = vmatprep.subr.bf16.mxu0 %v752_v0 }
  0x70   :  { %572 = vmatpush3.bf16.msra.mxu0 %v615_v56 }
  0x71   :  { %573 = vmatprep.subr.bf16.mxu0 %v752_v0 }
  0x74   :  { %574 = vmatpush3.bf16.msra.mxu0 %v616_v57 }
  0x75   :  { %575 = vmatprep.subr.bf16.mxu0 %v752_v0 }
  0x78   :  { %576 = vmatpush3.bf16.msra.mxu0 %v617_v58 }
  0x79   :  { %577 = vmatprep.subr.bf16.mxu0 %v752_v0 }
  0x7c   :  { %578 = vmatpush3.bf16.msra.mxu0 %v618_v59 }
  0x7d   :  { %579 = vmatprep.subr.bf16.mxu0 %v752_v0 }
  0x80   :  { %580 = vmatpush3.bf16.msra.mxu0 %v619_v60 }
  0x81   :  { %581 = vmatprep.subr.bf16.mxu0 %v752_v0 }
  0x84   :  { %582 = vmatpush3.bf16.msra.mxu0 %v620_v61 }
  0x85   :  { %583 = vmatprep.subr.bf16.mxu0 %v752_v0  ;;  %v342_v0 = vrot.slane %v869_v13, %v341_v8 }
  0x88   :  { %584 = vmatpush3.bf16.msra.mxu0 %v621_v62 }
 0x13e   :  { %v182_v15 = vpop.f32.mrb[0].mxu0 }
 0x13f   :  { %v183_v16 = vadd.f32 %v182_v15, %v99_v14  ;;  %v547_v17 = vpop.f32.mrb[1].mxu0 }
 0x140   :  { %v185_v18 = vpop.f32.mrb[2].mxu0 }
 0x141   :  { %188 = vadd.xlane.f32.xlu0 %v183_v16  ;;  %v548_v19 = vpop.f32.mrb[3].mxu0  ;;  %v190_v20 = vmul.f32 %v183_v16, %v183_v16 }
 0x142   :  { %v493_v19 = vld [vmem:[%s916_s5] ss:$0 sm:$0xff] }
 0x145   :  { %191 = vadd.xlane.f32.xlu0 %v190_v20 }
 0x1ce   :  { %v189_v29 = vpop.xlane.xlu0 %188 }
 0x1cf   :  { %v193_v30 = vmul.f32 0.03125, %v189_v29 }
 0x1d1   :  { %v195_v32 = vmul.f32 %v193_v30, %v193_v30  ;;  %v197_v38 = vsub.f32 %v183_v16, %v193_v30 }
 0x1d2   :  { %v192_v31 = vpop.xlane.xlu0 %191 }
 0x1d3   :  { %v194_v33 = vmul.f32 0.03125, %v192_v31 }
 0x1d5   :  { %v196_v34 = vsub.f32 %v194_v33, %v195_v32 }
 0x1d7   :  { %v198_v35 = vadd.f32 1e-05, %v196_v34 }
 0x1d9   :  { %622 = vrsqrt.f32 %v198_v35 }
 0x1e3   :  { %v623_v40 = vpop.eup %622 }
 0x1e4   :  { %v200_v41 = vmul.f32 %v623_v40, %v197_v38 }
 0x1e6   :  { %v205_v43 = vmul.f32 %v204_v39, %v200_v41 }
 0x1e8   :  { %v210_v44 = vadd.f32 %v209_v42, %v205_v43 }
 0x1ea   :  { %v211_v45 = vmax.f32 %v210_v44, 0.0 }
 0x1ec   :  { %v212_v46 = vpack.c.bf16 %v211_v45, %v211_v45 }
 0x1ee   :  { %566 = vmatmul.mubr.bf16.vlgmr.msra.gmra.mrb[0].mxu1 %v212_v46 }
 0x2c1   :  { %v315_v49 = vpop.f32.mrb[0].mxu1 }
 0x2c2   :  { %v316_v50 = vadd.f32 %v315_v49, %v232_v48  ;;  %v567_v51 = vpop.f32.mrb[1].mxu1 }
 0x2c3   :  { %v318_v52 = vpop.f32.mrb[2].mxu1 }
 0x2c4   :  { %321 = vadd.xlane.f32.xlu1 %v316_v50  ;;  %v568_v53 = vpop.f32.mrb[3].mxu1  ;;  %v323_v54 = vmul.f32 %v316_v50, %v316_v50 }
 0x2c8   :  { %324 = vadd.xlane.f32.xlu1 %v323_v54 }
 0x351   :  { %v322_v63 = vpop.xlane.xlu1 %321 }
 0x352   :  { %v326_v1 = vmul.f32 0.03125, %v322_v63 }
 0x354   :  { %v328_v3 = vmul.f32 %v326_v1, %v326_v1  ;;  %v330_v9 = vsub.f32 %v316_v50, %v326_v1 }
 0x355   :  { %v325_v2 = vpop.xlane.xlu1 %324 }
 0x356   :  { %v327_v4 = vmul.f32 0.03125, %v325_v2 }
 0x358   :  { %v329_v5 = vsub.f32 %v327_v4, %v328_v3 }
 0x35a   :  { %v331_v6 = vadd.f32 1e-05, %v329_v5 }
 0x35c   :  { %624 = vrsqrt.f32 %v331_v6 }
 0x366   :  { %v625_v12 = vpop.eup %624 }
 0x367   :  { %v333_v14 = vmul.f32 %v625_v12, %v330_v9 }
 0x369   :  { %v338_v15 = vmul.f32 %v337_v10, %v333_v14 }
 0x36b   :  { %v343_v16 = vadd.f32 %v342_v0, %v338_v15 }
 0x36d   :  { %v344_v17 = vmax.f32 %v343_v16, 0.0 }
 0x36f   :  { %v345_v18 = vpack.c.bf16 %v344_v17, %v344_v17 }
 0x371   :  { %586 = vmatmul.mubr.bf16.vlgmr.msra.gmra.mrb[4].mxu0 %v345_v18 }
 0x444   :  { %v451_v20 = vpop.f32.mrb[4].mxu0 }
 0x445   :  { %v452_v21 = vadd.f32 %v493_v19, %v451_v20  ;;  %v587_v22 = vpop.f32.mrb[5].mxu0 }
 0x446   :  { %v454_v11 = vpop.f32.mrb[6].mxu0 }
 0x447   :  { %626 = vtanh.f32 %v452_v21  ;;  %v588_v23 = vpop.f32.mrb[7].mxu0 }
 0x451   :  { %v627_v24 = vpop.eup %626 }
 0x452   :  { %v458_v25 = vpack.c.bf16 %v627_v24, %v627_v24 }
 0x454   :  { %459 = vst [vmem:[#allocation10] sm:$0xf] %v458_v25 }
 0x455   :  { %727 = shalt.err (!%p724_p8)
}
 0x456   :  { %s728_s25 = scalar_lea.hbm %s917_s6, 64 }
 0x457   :  { %p729_p9 = scmp.ne.s32.totalorder %s917_s6, %s728_s25  ;;  %p732_p10 = scmp.lt.u32.totalorder %s728_s25, %s917_s6 }
 0x459   :  { %p734_p11 = pnand %p732_p10, %p729_p9 }
 0x45b   :  { %737 = shalt.err (!%p734_p11)
}
 0x45c   :  { %469 = dma.vmem_to_hbm [thread:$0]  %s467_s22, 64, %s917_s6, [#allocation4]  }
 0x45d   :  { %744 = dma.done.wait [#allocation4], 64  }
 0x45e   :  { %745 = vsyncadd [#allocation4], 4294967232 }
 0x45f   :  { %473 = vsyncpa [#allocation3], 1 }
 0x460   :  { %474 = vsyncpa [#allocation6], 1 }
 0x461   :  { %475 = vsyncpa [#allocation9], 1 }
 0x462   :  { %476 = vsyncpa [#allocation4], 1 }

</bundles_post_ra>
